<compile_context>
chip_gen: v7x
topology: tpu7x:2x2x1
jax: 0.10.0
libtpu: 0.0.40
codegen_flags: <defaults>
</compile_context>

<pallas_src>
import jax
import jax.numpy as jnp
from jax.experimental import pallas as pl
from jax.experimental.pallas import tpu as pltpu

IN_FEATURES = 12 * 192   # 2304 = 18 * 128  (already lane-aligned)
HIDDEN = 100
OUT = 10
LANE = 128
ROW_ALIGN = 16           # bf16 packs 2 rows / sublane -> align tiles to 16


def _round_up(x, m):
    return (x + m - 1) // m * m


def _vmem_capacity_bytes():
    """Physical VMEM per TensorCore; conservative fallback (v7x) if the query
    is unavailable."""
    try:
        return int(pltpu.get_tpu_info().vmem_capacity_bytes)
    except Exception:
        return 64 * 1024 * 1024


def _linear_kernel(x_ref, w_ref, b_ref, o_ref):
    # x tile arrives float32; cast to bf16 on the VPU so the MXU gets its
    # native input while HBM only ever sees one f32 read of x.
    x_bf = x_ref[...].astype(jnp.bfloat16)
    acc = jnp.dot(x_bf, w_ref[...], preferred_element_type=jnp.float32)
    o_ref[...] = (acc + b_ref[...]).astype(o_ref.dtype)


def collapse_params(w1, b1, w2, b2, weight_dtype=jnp.bfloat16):
    """Collapse the two activation-free Linears and pad N 10 -> 128.
    Call once per weight update, NOT per forward."""
    w1f = w1.astype(jnp.float32)
    w2f = w2.astype(jnp.float32)
    w_eff = w1f @ w2f                                               # (2304, 10)
    b_eff = b1.astype(jnp.float32) @ w2f + b2.astype(jnp.float32)   # (10,)

    n_pad = _round_up(OUT, LANE)                                    # 128
    w_pad = jnp.zeros((IN_FEATURES, n_pad), weight_dtype)
    w_pad = w_pad.at[:, :OUT].set(w_eff.astype(weight_dtype))
    b_pad = jnp.zeros((1, n_pad), jnp.float32).at[:, :OUT].set(b_eff.reshape(1, OUT))
    return w_pad, b_pad


def classifier_forward(x, w_pad, b_pad, *, block_rows=None):
    """x: (B, ...) flattening to (B, 2304); w_pad: (2304, 128) bf16;
    b_pad: (1, 128) f32  ->  (B, 10) float32."""
    B = x.shape[0]
    x2d = x.reshape(B, -1)
    assert x2d.shape[1] == IN_FEATURES, (
        f"expected {IN_FEATURES} features, got {x2d.shape[1]}")
    n_pad = w_pad.shape[1]

    # --- generation-aware tiling / VMEM budget ---
    vmem_cap = _vmem_capacity_bytes()
    if block_rows is None:
        # 1024-row f32 tile = 9.4 MB (x2 buffers ~19 MB) fits 64 MiB VMEM (v7x);
        # 2048 rows (~38 MB double-buffered) fits 128 MiB (v5e/v6e).
        block_rows = 2048 if vmem_cap >= 96 * 1024 * 1024 else 1024
    vmem_limit = int(min(vmem_cap - 16 * 1024 * 1024, 100 * 1024 * 1024))

    # Aim for >= 2 grid steps when B allows so both v7x TensorCores get work;
    # tile rows aligned to 16 (bf16 output packs 2 rows per sublane).
    tm = max(ROW_ALIGN, min(block_rows, _round_up(pl.cdiv(B, 2), ROW_ALIGN)))
    grid = (pl.cdiv(B, tm),)

    x_itemsize = jnp.dtype(x2d.dtype).itemsize
    w_itemsize = jnp.dtype(w_pad.dtype).itemsize
    cost = pl.CostEstimate(
        flops=2 * B * IN_FEATURES * n_pad,
        transcendentals=0,
        bytes_accessed=(B * IN_FEATURES * x_itemsize
                        + IN_FEATURES * n_pad * w_itemsize
                        + B * n_pad * 2),
    )

    out = pl.pallas_call(
        _linear_kernel,
        out_shape=jax.ShapeDtypeStruct((B, n_pad), jnp.bfloat16),
        grid=grid,
        in_specs=[
            pl.BlockSpec((tm, IN_FEATURES), lambda i: (i, 0)),     # x tile (f32), pipelined
            pl.BlockSpec((IN_FEATURES, n_pad), lambda i: (0, 0)),  # weights resident
            pl.BlockSpec((1, n_pad), lambda i: (0, 0)),            # bias resident
        ],
        out_specs=pl.BlockSpec((tm, n_pad), lambda i: (i, 0)),
        compiler_params=pltpu.CompilerParams(
            dimension_semantics=("parallel",),     # megacore sharding on v7x
            vmem_limit_bytes=vmem_limit,
        ),
        cost_estimate=cost,
    )(x2d, w_pad, b_pad)

    return out[:B, :OUT].astype(jnp.float32)


def init_params(key):
    """nn.Linear-style init (uniform +/- 1/sqrt(fan_in)); weights stored
    as (in_features, out_features) for the x @ W convention."""
    k1, k2, k3, k4 = jax.random.split(key, 4)
    bound1 = 1.0 / jnp.sqrt(jnp.float32(IN_FEATURES))
    bound2 = 1.0 / jnp.sqrt(jnp.float32(HIDDEN))
    w1 = jax.random.uniform(k1, (IN_FEATURES, HIDDEN), jnp.float32, -bound1, bound1)
    b1 = jax.random.uniform(k2, (HIDDEN,), jnp.float32, -bound1, bound1)
    w2 = jax.random.uniform(k3, (HIDDEN, OUT), jnp.float32, -bound2, bound2)
    b2 = jax.random.uniform(k4, (OUT,), jnp.float32, -bound2, bound2)
    return w1, b1, w2, b2


if __name__ == "__main__":
    key = jax.random.PRNGKey(0)
    kx, kp = jax.random.split(key)

    # Input shaped like the sequence features feeding the classifier:
    # (B, 12, 192) flattens to (B, 2304) exactly as the module expects.
    B = 2
    x = jax.random.normal(kx, (B, 12, 192), jnp.float32)
    w1, b1, w2, b2 = init_params(kp)

    # Collapse/pad the weights once (loop-invariant for inference).
    w_pad, b_pad = collapse_params(w1, b1, w2, b2)

    y = classifier_forward(x, w_pad, b_pad)
    y = jax.block_until_ready(y)

    # Full-precision reference of the original two-Linear forward.
    y_ref = x.reshape(B, -1) @ w1 + b1
    y_ref = y_ref @ w2 + b2

    assert y.shape == (B, OUT)
    # bf16 weights/activations with f32 accumulation: loose-but-meaningful tol.
    assert jnp.allclose(y, y_ref, atol=3e-2, rtol=3e-2), (
        f"max abs err {jnp.max(jnp.abs(y - y_ref))}")

    print("KERNEL_OK")
</pallas_src>

<mosaic_0001>
module attributes {stable_mosaic.version = 11 : i64} {
  func.func @_linear_kernel(%arg0: i32, %arg1: memref<16x2304xf32, #tpu.memory_space<vmem>>, %arg2: memref<2304x128xbf16, #tpu.memory_space<vmem>>, %arg3: memref<1x128xf32, #tpu.memory_space<vmem>>, %arg4: memref<16x128xbf16, #tpu.memory_space<vmem>>) attributes {dimension_semantics = [#tpu.dimension_semantics<parallel>], iteration_bounds = array<i64: 1>, scalar_prefetch = 0 : i64, scratch_operands = 0 : i64, tpu.core_type = #tpu.core_type<tc>, window_params = [{transform_indices = @transform_0, window_bounds = array<i64: 16, 2304>}, {pipeline_mode = #tpu.pipeline_mode<synchronous>, transform_indices = @transform_1, window_bounds = array<i64: 2304, 128>}, {pipeline_mode = #tpu.pipeline_mode<synchronous>, transform_indices = @transform_2, window_bounds = array<i64: 1, 128>}, {transform_indices = @transform_3, window_bounds = array<i64: 16, 128>}]} {
    %c0 = arith.constant 0 : index
    %c0_0 = arith.constant 0 : index
    %0 = vector.load %arg1[%c0, %c0_0] : memref<16x2304xf32, #tpu.memory_space<vmem>>, vector<16x2304xf32>
    %1 = arith.truncf %0 : vector<16x2304xf32> to vector<16x2304xbf16>
    %c0_1 = arith.constant 0 : index
    %c0_2 = arith.constant 0 : index
    %2 = vector.load %arg2[%c0_1, %c0_2] : memref<2304x128xbf16, #tpu.memory_space<vmem>>, vector<2304x128xbf16>
    %cst = arith.constant dense<0.000000e+00> : vector<16x128xf32>
    %3 = tpu.matmul %1, %2, %cst {dimension_numbers = #tpu.dot_dimension_numbers<[1], [0], [0], [1], [0, 0, 1, 1], [], []>} : vector<16x2304xbf16>, vector<2304x128xbf16>, vector<16x128xf32> -> vector<16x128xf32>
    %c0_3 = arith.constant 0 : index
    %c0_4 = arith.constant 0 : index
    %4 = vector.load %arg3[%c0_3, %c0_4] : memref<1x128xf32, #tpu.memory_space<vmem>>, vector<1x128xf32>
    %5 = vector.broadcast %4 : vector<1x128xf32> to vector<16x128xf32>
    %6 = arith.addf %3, %5 : vector<16x128xf32>
    %7 = arith.truncf %6 : vector<16x128xf32> to vector<16x128xbf16>
    %c0_5 = arith.constant 0 : index
    %c0_6 = arith.constant 0 : index
    %8 = vector.load %arg4[%c0_5, %c0_6] : memref<16x128xbf16, #tpu.memory_space<vmem>>, vector<16x128xbf16>
    tpu.vector_store %arg4[%c0_5, %c0_6], %7 {strides = array<i32>} : memref<16x128xbf16, #tpu.memory_space<vmem>>, vector<16x128xbf16>,
    return
  }
  func.func @transform_0(%arg0: i32) -> (i32, i32) {
    %c0_i32 = arith.constant 0 : i32
    %c0_i32_0 = arith.constant 0 : i32
    return %arg0, %c0_i32 : i32, i32
  }
  func.func @transform_1(%arg0: i32) -> (i32, i32) {
    %c0_i32 = arith.constant 0 : i32
    %c0_i32_0 = arith.constant 0 : i32
    %c0_i32_1 = arith.constant 0 : i32
    return %c0_i32, %c0_i32_0 : i32, i32
  }
  func.func @transform_2(%arg0: i32) -> (i32, i32) {
    %c0_i32 = arith.constant 0 : i32
    %c0_i32_0 = arith.constant 0 : i32
    %c0_i32_1 = arith.constant 0 : i32
    return %c0_i32, %c0_i32_0 : i32, i32
  }
  func.func @transform_3(%arg0: i32) -> (i32, i32) {
    %c0_i32 = arith.constant 0 : i32
    %c0_i32_0 = arith.constant 0 : i32
    return %arg0, %c0_i32 : i32, i32
  }
}

</mosaic_0001>

<bundles_post_ra>
// kernel: tpu_custom_call.1
= control target key start
LH: loop header
LB: loop body
LE: loop exit
PB: predicated region body
PF: predicated region fallthrough
CT: control target
= control target key end

     0   :  { %8 = vsyncpa [#allocation3], 0  ;;  %s2854_s0 = inlined_call_operand.hbm [shape: f32[2,2304], index: 0, kind: input, shape index: {}]   ;;  %s2855_s1 = inlined_call_operand.hbm [shape: bf16[2304,128], index: 1, kind: input, shape index: {}]   ;;  %s2856_s2 = inlined_call_operand.vmem [shape: f32[1,128], index: 2, kind: input, shape index: {}]   ;;  %s2857_s3 = inlined_call_operand.hbm [shape: bf16[2,128], index: 3, kind: output, shape index: {}]  }
   0x1   :  { %9 = vsyncpa [#allocation6], 0 }
   0x2   :  { %10 = vsyncpa [#allocation4], 0 }
   0x3   :  { %15 = vsyncadd [#allocation3], 4032  ;;  %s2742_s12 = smov [#allocation2]   ;;  %s2670_s16 = scalar_lea.hbm %s2854_s0, 576 }
   0x4   :  { %s16_s13 = sshll.u32 %s2742_s12, 4  ;;  %p2671_p0 = scmp.ne.s32.totalorder %s2854_s0, %s2670_s16  ;;  %s17_s13 = int_to_ptr.vmem [resolvable:$true] %s16_s13 }
   0x5   :  { %p2674_p1 = scmp.lt.u32.totalorder %s2670_s16, %s2854_s0 }
   0x7   :  { %p2676_p2 = pnand %p2674_p1, %p2671_p0 }
   0x9   :  { %2679 = shalt.err (!%p2676_p2)
}
   0xa   :  { %s2680_s21 = scalar_lea.vmem %s17_s13, 576  ;;  %s2684_s22 = scalar_lea.vmem %s17_s13, 4608 }
   0xb   :  { %p2681_p3 = scmp.ne.s32.totalorder %s17_s13, %s2680_s21  ;;  %p2685_p4 = scmp.lt.s32.totalorder %s17_s13, %s17_s13 }
   0xc   :  { %p2686_p5 = scmp.lt.s32.totalorder %s2684_s22, %s2680_s21 }
   0xe   :  { %p2687_p6 = por %p2686_p5, %p2685_p4 }
  0x10   :  { %p2688_p7 = pnand %p2687_p6, %p2681_p3 }
  0x12   :  { %2691 = shalt.err (!%p2688_p7)
}
  0x13   :  { %s2743_s23 = smov 576   ;;  %s2744_s24 = smov 36  }
  0x14   :  { %22 = dma.hbm_to_vmem [thread:$0]  %s2854_s0, 576, %s17_s13, [#allocation3], %s2743_s23, %s2743_s23, %s2744_s24  }
  0x15   :  { %s2745_s27 = smov [#allocation5]   ;;  %s2692_s4 = scalar_lea.hbm %s2855_s1, 18432 }
  0x16   :  { %s28_s28 = sshll.u32 %s2745_s27, 4  ;;  %p2693_p8 = scmp.ne.s32.totalorder %s2855_s1, %s2692_s4  ;;  %s29_s28 = int_to_ptr.vmem [resolvable:$true] %s28_s28 }
  0x17   :  { %p2696_p9 = scmp.lt.u32.totalorder %s2692_s4, %s2855_s1 }
  0x19   :  { %p2698_p10 = pnand %p2696_p9, %p2693_p8 }
  0x1b   :  { %2701 = shalt.err (!%p2698_p10)
}
  0x1c   :  { %s2702_s9 = scalar_lea.vmem %s29_s28, 18432  ;;  %p2707_p12 = scmp.lt.s32.totalorder %s29_s28, %s29_s28 }
  0x1d   :  { %p2703_p11 = scmp.ne.s32.totalorder %s29_s28, %s2702_s9  ;;  %p2708_p13 = scmp.lt.s32.totalorder %s2702_s9, %s2702_s9 }
  0x1f   :  { %p2709_p0 = por %p2708_p13, %p2707_p12 }
  0x21   :  { %p2710_p1 = pnand %p2709_p0, %p2703_p11 }
  0x23   :  { %2713 = shalt.err (!%p2710_p1)
}
  0x24   :  { %s2746_s0 = smov 64   ;;  %s2747_s10 = smov 4  }
  0x25   :  { %34 = dma.hbm_to_vmem [thread:$0]  %s2855_s1, 18432, %s29_s28, [#allocation6], %s2746_s0, %s2746_s0, %s2747_s10  }
  0x26   :  { %2736 = dma.done.wait [#allocation3], 4608  }
  0x27   :  { %2737 = vsyncadd [#allocation3], 4294962688 }
  0x28   :  { %2738 = dma.done.wait [#allocation6], 18432  }
  0x29   :  { %2739 = vsyncadd [#allocation6], 4294948864  ;;  %v2474_v0 = vld [vmem:[#allocation5 + $0x40] sm:$0xff]   ;;  %v2478_v4 = vld [vmem:[#allocation5 + $0x48] sm:$0xff]   ;;  %v2748_v24 = vmov 1983009808   ;;  %v131_v26 = vlaneseq }
  0x2a   :  { %v2475_v1 = vld [vmem:[#allocation5] sm:$0xff]   ;;  %2265 = vmatprep.subr.bf16.mxu0 %v2474_v0  ;;  %v2479_v5 = vld [vmem:[#allocation5 + $0x8] sm:$0xff]   ;;  %v2482_v8 = vld [vmem:[#allocation5 + $0x50] sm:$0xff]   ;;  %v129_v25 = vunpack.c.l.s4 %v2748_v24 }
  0x2b   :  { %v2476_v2 = vld [vmem:[#allocation5 + $0xc0] sm:$0xff]   ;;  %2266 = vmatpush3.bf16.msra.mxu0 %v2475_v1  ;;  %v2480_v6 = vld [vmem:[#allocation5 + $0xc8] sm:$0xff]   ;;  %v2483_v9 = vld [vmem:[#allocation5 + $0x10] sm:$0xff]   ;;  %v2797_v32 = vshrl.u32 %v131_v26, 7 }
  0x2c   :  { %v2477_v3 = vld [vmem:[#allocation5 + $0x80] sm:$0xff]   ;;  %2287 = vmatprep.subr.bf16.mxu1 %v2476_v2  ;;  %2267 = vmatprep.subr.bf16.mxu0 %v2478_v4  ;;  %v2481_v7 = vld [vmem:[#allocation5 + $0x88] sm:$0xff]   ;;  %v2484_v10 = vld [vmem:[#allocation5 + $0xd0] sm:$0xff]   ;;  %v130_v31 = vunpack.c.0.s8 %v129_v25 }
  0x2d   :  { %2288 = vmatpush3.bf16.msra.mxu1 %v2477_v3  ;;  %v2485_v11 = vld [vmem:[#allocation5 + $0x90] sm:$0xff]   ;;  %v2486_v12 = vld [vmem:[#allocation5 + $0x58] sm:$0xff]   ;;  %v2490_v16 = vld [vmem:[#allocation5 + $0x60] sm:$0xff]  }
  0x2e   :  { %2289 = vmatprep.subr.bf16.mxu1 %v2480_v6  ;;  %v2487_v13 = vld [vmem:[#allocation5 + $0x18] sm:$0xff]   ;;  %v2491_v17 = vld [vmem:[#allocation5 + $0x20] sm:$0xff]   ;;  %v2494_v20 = vld [vmem:[#allocation5 + $0x68] sm:$0xff]   ;;  %v2800_v36 = vsub.s32 %v130_v31, %v2797_v32 }
  0x2f   :  { %2268 = vmatpush3.bf16.msra.mxu0 %v2479_v5  ;;  %v2488_v14 = vld [vmem:[#allocation5 + $0xd8] sm:$0xff]   ;;  %v2492_v18 = vld [vmem:[#allocation5 + $0xe0] sm:$0xff]   ;;  %v2495_v21 = vld [vmem:[#allocation5 + $0x28] sm:$0xff]  }
  0x30   :  { %2269 = vmatprep.subr.bf16.mxu0 %v2482_v8  ;;  %v2489_v15 = vld [vmem:[#allocation5 + $0x98] sm:$0xff]   ;;  %v2493_v19 = vld [vmem:[#allocation5 + $0xa0] sm:$0xff]   ;;  %v2496_v22 = vld [vmem:[#allocation5 + $0xe8] sm:$0xff]  }
  0x31   :  { %2290 = vmatpush3.bf16.msra.mxu1 %v2481_v7  ;;  %v2497_v23 = vld [vmem:[#allocation5 + $0xa8] sm:$0xff]   ;;  %v2498_v27 = vld [vmem:[#allocation5 + $0x70] sm:$0xff]   ;;  %v2502_v33 = vld [vmem:[#allocation5 + $0x78] sm:$0xff]  }
  0x32   :  { %2291 = vmatprep.subr.bf16.mxu1 %v2484_v10  ;;  %v2499_v28 = vld [vmem:[#allocation5 + $0x30] sm:$0xff]   ;;  %v2503_v34 = vld [vmem:[#allocation5 + $0x38] sm:$0xff]   ;;  %v2505_v37 = vld [vmem:[#allocation2] ss:$36 sps:$4 sm:$0xff]  }
  0x33   :  { %2270 = vmatpush3.bf16.msra.mxu0 %v2483_v9  ;;  %v2500_v29 = vld [vmem:[#allocation5 + $0xf0] sm:$0xff]   ;;  %v2504_v35 = vld [vmem:[#allocation5 + $0xf8] sm:$0xff]   ;;  %v2507_v38 = vld [vmem:[#allocation2 + $0x48] ss:$36 sps:$4 sm:$0xff]   ;;  %v134_v41 = vrot.slane %v2505_v37, %v2800_v36 }
  0x34   :  { %2271 = vmatprep.subr.bf16.mxu0 %v2486_v12  ;;  %v2501_v30 = vld [vmem:[#allocation5 + $0xb0] sm:$0xff]   ;;  %v2511_v40 = vld [vmem:[#allocation2 + $0xd8] ss:$36 sps:$4 sm:$0xff]   ;;  %v148_v43 = vrot.slane %v2507_v38, %v2800_v36  ;;  %v2514_v46 = vld [vmem:[#allocation5 + $0x140] sm:$0xff]  }
  0x35   :  { %2292 = vmatpush3.bf16.msra.mxu1 %v2485_v11  ;;  %v2509_v39 = vld [vmem:[#allocation2 + $0x90] ss:$36 sps:$4 sm:$0xff]   ;;  %v2513_v42 = vld [vmem:[#allocation5 + $0xb8] sm:$0xff]   ;;  %v310_v45 = vrot.slane %v2511_v40, %v2800_v36  ;;  %v2515_v47 = vld [vmem:[#allocation2 + $0x4] ss:$36 sps:$4 sm:$0xff]  }
  0x36   :  { %2293 = vmatprep.subr.bf16.mxu1 %v2488_v14  ;;  %v296_v44 = vrot.slane %v2509_v39, %v2800_v36  ;;  %v2516_v48 = vld [vmem:[#allocation2 + $0x4c] ss:$36 sps:$4 sm:$0xff]   ;;  %v2517_v49 = vld [vmem:[#allocation2 + $0x94] ss:$36 sps:$4 sm:$0xff]   ;;  %v157_v50 = vcombine.high %v134_v41, %v148_v43  ;;  %v156_v52 = vcombine.low %v134_v41, %v148_v43  ;;  %v2518_v54 = vld [vmem:[#allocation2 + $0xdc] ss:$36 sps:$4 sm:$0xff]   ;;  %v141_v55 = vrot.slane %v2515_v47, %v2800_v36 }
  0x37   :  { %2272 = vmatpush3.bf16.msra.mxu0 %v2487_v13  ;;  %v155_v56 = vrot.slane %v2516_v48, %v2800_v36  ;;  %v303_v57 = vrot.slane %v2517_v49, %v2800_v36  ;;  %v2519_v58 = vld [vmem:[#allocation5 + $0x100] sm:$0xff]   ;;  %v317_v61 = vrot.slane %v2518_v54, %v2800_v36  ;;  %v2522_v3 = vld [vmem:[#allocation5 + $0x148] sm:$0xff]   ;;  %v2526_v9 = vld [vmem:[#allocation5 + $0x150] sm:$0xff]  }
  0x38   :  { %2273 = vmatprep.subr.bf16.mxu0 %v2490_v16  ;;  %v319_v51 = vcombine.high %v296_v44, %v310_v45  ;;  %v318_v53 = vcombine.low %v296_v44, %v310_v45  ;;  %v2520_v62 = vld [vmem:[#allocation5 + $0x1c0] sm:$0xff]   ;;  %v2523_v7 = vld [vmem:[#allocation5 + $0x108] sm:$0xff]   ;;  %v2527_v11 = vld [vmem:[#allocation5 + $0x110] sm:$0xff]  }
  0x39   :  { %2294 = vmatpush3.bf16.msra.mxu1 %v2489_v15  ;;  %v159_v63 = vcombine.high %v141_v55, %v155_v56  ;;  %v158_v0 = vcombine.low %v141_v55, %v155_v56  ;;  %v321_v1 = vcombine.high %v303_v57, %v317_v61  ;;  %v320_v2 = vcombine.low %v303_v57, %v317_v61  ;;  %v2521_v4 = vld [vmem:[#allocation5 + $0x180] sm:$0xff]   ;;  %v2524_v8 = vld [vmem:[#allocation5 + $0x1c8] sm:$0xff]   ;;  %v2528_v12 = vld [vmem:[#allocation5 + $0x1d0] sm:$0xff]  }
  0x3a   :  { %2295 = vmatprep.subr.bf16.mxu1 %v2492_v18  ;;  %v485_v59 = vpack.c.bf16 %v319_v51, %v157_v50  ;;  %v484_v60 = vpack.c.bf16 %v318_v53, %v156_v52  ;;  %v2525_v10 = vld [vmem:[#allocation5 + $0x188] sm:$0xff]   ;;  %v2530_v13 = vld [vmem:[#allocation5 + $0x158] sm:$0xff]   ;;  %v2529_v14 = vld [vmem:[#allocation5 + $0x190] sm:$0xff]  }
  0x3b   :  { %2274 = vmatpush3.bf16.msra.mxu0 %v2491_v17  ;;  %v487_v5 = vpack.c.bf16 %v321_v1, %v159_v63  ;;  %v486_v6 = vpack.c.bf16 %v320_v2, %v158_v0  ;;  %v2531_v15 = vld [vmem:[#allocation5 + $0x118] sm:$0xff]   ;;  %v2534_v17 = vld [vmem:[#allocation5 + $0x160] sm:$0xff]   ;;  %v2540_v24 = vld [vmem:[#allocation5 + $0x1e8] sm:$0xff]  }
  0x3c   :  { %2275 = vmatprep.subr.bf16.mxu0 %v2494_v20  ;;  %1693 = vmatprep.mubr.bf16.mxu0 %v485_v59  ;;  %v2532_v16 = vld [vmem:[#allocation5 + $0x1d8] sm:$0xff]   ;;  %v2536_v20 = vld [vmem:[#allocation5 + $0x1e0] sm:$0xff]   ;;  %v2542_v25 = vld [vmem:[#allocation5 + $0x170] sm:$0xff]  }
  0x3d   :  { %2296 = vmatpush3.bf16.msra.mxu1 %v2493_v19  ;;  %1734 = vmatprep.mubr.bf16.mxu1 %v487_v5  ;;  %v2533_v18 = vld [vmem:[#allocation5 + $0x198] sm:$0xff]   ;;  %v2535_v19 = vld [vmem:[#allocation5 + $0x120] sm:$0xff]   ;;  %v2541_v26 = vld [vmem:[#allocation5 + $0x1a8] sm:$0xff]  }
  0x3e   :  { %2297 = vmatprep.subr.bf16.mxu1 %v2496_v22  ;;  %v2537_v22 = vld [vmem:[#allocation5 + $0x1a0] sm:$0xff]   ;;  %v2547_v31 = vld [vmem:[#allocation5 + $0x138] sm:$0xff]   ;;  %v2559_v45 = vld [vmem:[#allocation2 + $0xc] ss:$36 sps:$4 sm:$0xff]  }
  0x3f   :  { %2276 = vmatpush3.bf16.msra.mxu0 %v2495_v21  ;;  %v2538_v21 = vld [vmem:[#allocation5 + $0x168] sm:$0xff]   ;;  %v2553_v37 = vld [vmem:[#allocation2 + $0x98] ss:$36 sps:$4 sm:$0xff]   ;;  %v2555_v38 = vld [vmem:[#allocation2 + $0xe0] ss:$36 sps:$4 sm:$0xff]   ;;  %v177_v53 = vrot.slane %v2559_v45, %v2800_v36 }
  0x40   :  { %2277 = vmatprep.subr.bf16.mxu0 %v2498_v27  ;;  %v2543_v27 = vld [vmem:[#allocation5 + $0x130] sm:$0xff]   ;;  %v332_v41 = vrot.slane %v2553_v37, %v2800_v36  ;;  %v346_v43 = vrot.slane %v2555_v38, %v2800_v36  ;;  %v2558_v44 = vld [vmem:[#allocation5 + $0x240] sm:$0xff]   ;;  %v2566_v1 = vld [vmem:[#allocation5 + $0x248] sm:$0xff]  }
  0x41   :  { %2298 = vmatpush3.bf16.msra.mxu1 %v2497_v23  ;;  %v2539_v23 = vld [vmem:[#allocation5 + $0x128] sm:$0xff]   ;;  %v2561_v49 = vld [vmem:[#allocation2 + $0x9c] ss:$36 sps:$4 sm:$0xff]  }
  0x42   :  { %2299 = vmatprep.subr.bf16.mxu1 %v2500_v29  ;;  %v2545_v29 = vld [vmem:[#allocation5 + $0x1b0] sm:$0xff]   ;;  %v2562_v50 = vld [vmem:[#allocation2 + $0xe4] ss:$36 sps:$4 sm:$0xff]   ;;  %v355_v51 = vcombine.high %v332_v41, %v346_v43  ;;  %v354_v52 = vcombine.low %v332_v41, %v346_v43  ;;  %v339_v55 = vrot.slane %v2561_v49, %v2800_v36 }
  0x43   :  { %2278 = vmatpush3.bf16.msra.mxu0 %v2499_v28  ;;  %v2544_v28 = vld [vmem:[#allocation5 + $0x1f0] sm:$0xff]   ;;  %v353_v56 = vrot.slane %v2562_v50, %v2800_v36  ;;  %v2564_v57 = vld [vmem:[#allocation5 + $0x2c0] sm:$0xff]   ;;  %v2567_v5 = vld [vmem:[#allocation5 + $0x208] sm:$0xff]  }
  0x44   :  { %2279 = vmatprep.subr.bf16.mxu0 %v2502_v33  ;;  %v2548_v33 = vld [vmem:[#allocation5 + $0x1f8] sm:$0xff]   ;;  %v2565_v2 = vld [vmem:[#allocation5 + $0x280] sm:$0xff]  }
  0x45   :  { %2300 = vmatpush3.bf16.msra.mxu1 %v2501_v30  ;;  %v2546_v30 = vld [vmem:[#allocation5 + $0x178] sm:$0xff]   ;;  %v356_v0 = vcombine.low %v339_v55, %v353_v56 }
  0x46   :  { %2301 = vmatprep.subr.bf16.mxu1 %v2504_v35  ;;  %v2551_v35 = vld [vmem:[#allocation2 + $0x50] ss:$36 sps:$4 sm:$0xff]  }
  0x47   :  { %2280 = vmatpush3.bf16.msra.mxu0 %v2503_v34  ;;  %v2549_v34 = vld [vmem:[#allocation2 + $0x8] ss:$36 sps:$4 sm:$0xff]   ;;  %v184_v40 = vrot.slane %v2551_v35, %v2800_v36  ;;  %v2603_v43 = vld [vmem:[#allocation2 + $0x14] ss:$36 sps:$4 sm:$0xff]  }
  0x48   :  { %2309 = vmatprep.subr.bf16.mxu0 %v2514_v46  ;;  %v170_v39 = vrot.slane %v2549_v34, %v2800_v36  ;;  %v2560_v46 = vld [vmem:[#allocation2 + $0x54] ss:$36 sps:$4 sm:$0xff]   ;;  %v2597_v34 = vld [vmem:[#allocation2 + $0xa0] ss:$36 sps:$4 sm:$0xff]   ;;  %v2599_v35 = vld [vmem:[#allocation2 + $0xe8] ss:$36 sps:$4 sm:$0xff]  }
  0x49   :  { %2302 = vmatpush3.bf16.msra.mxu1 %v2513_v42  ;;  %v2557_v42 = vld [vmem:[#allocation5 + $0x1b8] sm:$0xff]   ;;  %v191_v54 = vrot.slane %v2560_v46, %v2800_v36  ;;  %v382_v41 = vrot.slane %v2599_v35, %v2800_v36 }
  0x4a   :  { %2331 = vmatprep.subr.bf16.mxu1 %v2520_v62  ;;  %1694 = vmatmul.mubr.bf16.vlgmr.msra.gmra.mrb[0].mxu0 %v484_v60  ;;  %v193_v47 = vcombine.high %v170_v39, %v184_v40  ;;  %v192_v48 = vcombine.low %v170_v39, %v184_v40  ;;  %v2563_v60 = vld [vmem:[#allocation5 + $0x200] sm:$0xff]   ;;  %v357_v62 = vcombine.high %v339_v55, %v353_v56  ;;  %v2601_v39 = vld [vmem:[#allocation5 + $0x2b8] sm:$0xff]  }
  0x4b   :  { %2310 = vmatpush3.bf16.msra.mxu0 %v2519_v58  ;;  %v195_v61 = vcombine.high %v177_v53, %v191_v54  ;;  %v194_v63 = vcombine.low %v177_v53, %v191_v54  ;;  %v368_v40 = vrot.slane %v2597_v34, %v2800_v36  ;;  %v2604_v46 = vld [vmem:[#allocation2 + $0x5c] ss:$36 sps:$4 sm:$0xff]  }
  0x4c   :  { %2311 = vmatprep.subr.bf16.mxu0 %v2522_v3  ;;  %1735 = vmatmul.mubr.bf16.vlgmr.msra.gmra.mrb[0].mxu1 %v486_v6  ;;  %v489_v58 = vpack.c.bf16 %v355_v51, %v193_v47  ;;  %v488_v59 = vpack.c.bf16 %v354_v52, %v192_v48  ;;  %v2568_v6 = vld [vmem:[#allocation5 + $0x2c8] sm:$0xff]   ;;  %v213_v51 = vrot.slane %v2603_v43, %v2800_v36  ;;  %v2608_v55 = vld [vmem:[#allocation5 + $0x3c0] sm:$0xff]   ;;  %v2645_v35 = vld [vmem:[#allocation5 + $0x3b8] sm:$0xff]  }
  0x4d   :  { %2332 = vmatpush3.bf16.msra.mxu1 %v2521_v4  ;;  %v491_v3 = vpack.c.bf16 %v357_v62, %v195_v61  ;;  %v490_v4 = vpack.c.bf16 %v356_v0, %v194_v63  ;;  %v2605_v47 = vld [vmem:[#allocation2 + $0xa4] ss:$36 sps:$4 sm:$0xff]   ;;  %v2606_v48 = vld [vmem:[#allocation2 + $0xec] ss:$36 sps:$4 sm:$0xff]   ;;  %v391_v49 = vcombine.high %v368_v40, %v382_v41  ;;  %v390_v50 = vcombine.low %v368_v40, %v382_v41  ;;  %v2647_v41 = vld [vmem:[#allocation2 + $0x1c] ss:$36 sps:$4 sm:$0xff]  }
  0x4e   :  { %2333 = vmatprep.subr.bf16.mxu1 %v2524_v8  ;;  %1775 = vmatprep.mubr.bf16.mxu0 %v489_v58  ;;  %v2569_v8 = vld [vmem:[#allocation5 + $0x288] sm:$0xff]   ;;  %v227_v52 = vrot.slane %v2604_v46, %v2800_v36  ;;  %v375_v53 = vrot.slane %v2605_v47, %v2800_v36  ;;  %v389_v54 = vrot.slane %v2606_v48, %v2800_v36  ;;  %v2607_v58 = vld [vmem:[#allocation5 + $0x300] sm:$0xff]   ;;  %v2650_v48 = vld [vmem:[#allocation2 + $0xf4] ss:$36 sps:$4 sm:$0xff]  }
  0x4f   :  { %2312 = vmatpush3.bf16.msra.mxu0 %v2523_v7  ;;  %1816 = vmatprep.mubr.bf16.mxu1 %v491_v3  ;;  %v2570_v7 = vld [vmem:[#allocation5 + $0x250] sm:$0xff]   ;;  %v2610_v63 = vld [vmem:[#allocation5 + $0x348] sm:$0xff]   ;;  %v2609_v0 = vld [vmem:[#allocation5 + $0x380] sm:$0xff]  }
  0x50   :  { %2313 = vmatprep.subr.bf16.mxu0 %v2526_v9  ;;  %v2571_v9 = vld [vmem:[#allocation5 + $0x210] sm:$0xff]   ;;  %v230_v61 = vcombine.low %v213_v51, %v227_v52  ;;  %v392_v62 = vcombine.low %v375_v53, %v389_v54  ;;  %v2611_v3 = vld [vmem:[#allocation5 + $0x308] sm:$0xff]   ;;  %v2646_v40 = vld [vmem:[#allocation5 + $0x440] sm:$0xff]  }
  0x51   :  { %2334 = vmatpush3.bf16.msra.mxu1 %v2525_v10  ;;  %v2572_v10 = vld [vmem:[#allocation5 + $0x2d0] sm:$0xff]  }
  0x52   :  { %2335 = vmatprep.subr.bf16.mxu1 %v2528_v12  ;;  %v2573_v12 = vld [vmem:[#allocation5 + $0x290] sm:$0xff]  }
  0x53   :  { %2314 = vmatpush3.bf16.msra.mxu0 %v2527_v11  ;;  %v2574_v11 = vld [vmem:[#allocation5 + $0x258] sm:$0xff]   ;;  %v2649_v43 = vld [vmem:[#allocation2 + $0xac] ss:$36 sps:$4 sm:$0xff]  }
  0x54   :  { %2315 = vmatprep.subr.bf16.mxu0 %v2530_v13  ;;  %v2575_v13 = vld [vmem:[#allocation5 + $0x218] sm:$0xff]  }
  0x55   :  { %2336 = vmatpush3.bf16.msra.mxu1 %v2529_v14  ;;  %v2576_v14 = vld [vmem:[#allocation5 + $0x2d8] sm:$0xff]  }
  0x56   :  { %2337 = vmatprep.subr.bf16.mxu1 %v2532_v16  ;;  %v2577_v16 = vld [vmem:[#allocation5 + $0x298] sm:$0xff]  }
  0x57   :  { %2316 = vmatpush3.bf16.msra.mxu0 %v2531_v15  ;;  %v2578_v15 = vld [vmem:[#allocation5 + $0x260] sm:$0xff]  }
  0x58   :  { %2317 = vmatprep.subr.bf16.mxu0 %v2534_v17  ;;  %v2579_v17 = vld [vmem:[#allocation5 + $0x220] sm:$0xff]  }
  0x59   :  { %2338 = vmatpush3.bf16.msra.mxu1 %v2533_v18  ;;  %v2580_v18 = vld [vmem:[#allocation5 + $0x2e0] sm:$0xff]  }
  0x5a   :  { %2339 = vmatprep.subr.bf16.mxu1 %v2536_v20  ;;  %v2581_v20 = vld [vmem:[#allocation5 + $0x2a0] sm:$0xff]  }
  0x5b   :  { %2318 = vmatpush3.bf16.msra.mxu0 %v2535_v19  ;;  %v2582_v19 = vld [vmem:[#allocation5 + $0x268] sm:$0xff]  }
  0x5c   :  { %2319 = vmatprep.subr.bf16.mxu0 %v2538_v21  ;;  %v2583_v21 = vld [vmem:[#allocation5 + $0x228] sm:$0xff]  }
  0x5d   :  { %2340 = vmatpush3.bf16.msra.mxu1 %v2537_v22  ;;  %v2584_v22 = vld [vmem:[#allocation5 + $0x2e8] sm:$0xff]  }
  0x5e   :  { %2341 = vmatprep.subr.bf16.mxu1 %v2540_v24  ;;  %v2585_v24 = vld [vmem:[#allocation5 + $0x2a8] sm:$0xff]  }
  0x5f   :  { %2320 = vmatpush3.bf16.msra.mxu0 %v2539_v23  ;;  %v2586_v23 = vld [vmem:[#allocation5 + $0x270] sm:$0xff]  }
  0x60   :  { %2321 = vmatprep.subr.bf16.mxu0 %v2542_v25  ;;  %v2587_v25 = vld [vmem:[#allocation5 + $0x230] sm:$0xff]  }
  0x61   :  { %2342 = vmatpush3.bf16.msra.mxu1 %v2541_v26  ;;  %v2588_v26 = vld [vmem:[#allocation5 + $0x2f0] sm:$0xff]  }
  0x62   :  { %2343 = vmatprep.subr.bf16.mxu1 %v2544_v28  ;;  %v2590_v28 = vld [vmem:[#allocation5 + $0x278] sm:$0xff]  }
  0x63   :  { %2322 = vmatpush3.bf16.msra.mxu0 %v2543_v27  ;;  %v2589_v27 = vld [vmem:[#allocation5 + $0x2b0] sm:$0xff]  }
  0x64   :  { %2323 = vmatprep.subr.bf16.mxu0 %v2546_v30  ;;  %v2592_v30 = vld [vmem:[#allocation5 + $0x2f8] sm:$0xff]  }
  0x65   :  { %2344 = vmatpush3.bf16.msra.mxu1 %v2545_v29  ;;  %v2591_v29 = vld [vmem:[#allocation5 + $0x238] sm:$0xff]  }
  0x66   :  { %2345 = vmatprep.subr.bf16.mxu1 %v2548_v33  ;;  %v2595_v33 = vld [vmem:[#allocation2 + $0x58] ss:$36 sps:$4 sm:$0xff]  }
  0x67   :  { %2324 = vmatpush3.bf16.msra.mxu0 %v2547_v31  ;;  %v2593_v31 = vld [vmem:[#allocation2 + $0x10] ss:$36 sps:$4 sm:$0xff]   ;;  %v220_v38 = vrot.slane %v2595_v33, %v2800_v36 }
  0x68   :  { %2353 = vmatprep.subr.bf16.mxu0 %v2558_v44  ;;  %v206_v37 = vrot.slane %v2593_v31, %v2800_v36  ;;  %v2641_v31 = vld [vmem:[#allocation2 + $0xa8] ss:$36 sps:$4 sm:$0xff]   ;;  %v2643_v33 = vld [vmem:[#allocation2 + $0xf0] ss:$36 sps:$4 sm:$0xff]  }
  0x69   :  { %2346 = vmatpush3.bf16.msra.mxu1 %v2557_v42  ;;  %v2602_v42 = vld [vmem:[#allocation5 + $0x340] sm:$0xff]  }
  0x6a   :  { %2375 = vmatprep.subr.bf16.mxu1 %v2564_v57  ;;  %1776 = vmatmul.mubr.bf16.vlgmr.msra.gmra.mrb[4].mxu0 %v488_v59  ;;  %v229_v44 = vcombine.high %v206_v37, %v220_v38  ;;  %v228_v45 = vcombine.low %v206_v37, %v220_v38  ;;  %v231_v59 = vcombine.high %v213_v51, %v227_v52 }
  0x6b   :  { %2354 = vmatpush3.bf16.msra.mxu0 %v2563_v60  ;;  %v393_v60 = vcombine.high %v375_v53, %v389_v54  ;;  %v404_v38 = vrot.slane %v2641_v31, %v2800_v36  ;;  %v411_v51 = vrot.slane %v2649_v43, %v2800_v36  ;;  %v425_v54 = vrot.slane %v2650_v48, %v2800_v36 }
  0x6c   :  { %2355 = vmatprep.subr.bf16.mxu0 %v2566_v1  ;;  %1817 = vmatmul.mubr.bf16.vlgmr.msra.gmra.mrb[4].mxu1 %v490_v4  ;;  %v493_v56 = vpack.c.bf16 %v391_v49, %v229_v44  ;;  %v492_v57 = vpack.c.bf16 %v390_v50, %v228_v45  ;;  %v2612_v4 = vld [vmem:[#allocation5 + $0x3c8] sm:$0xff]   ;;  %v249_v49 = vrot.slane %v2647_v41, %v2800_v36 }
  0x6d   :  { %2376 = vmatpush3.bf16.msra.mxu1 %v2565_v2  ;;  %v495_v1 = vpack.c.bf16 %v393_v60, %v231_v59  ;;  %v494_v2 = vpack.c.bf16 %v392_v62, %v230_v61  ;;  %v429_v59 = vcombine.high %v411_v51, %v425_v54  ;;  %v428_v60 = vcombine.low %v411_v51, %v425_v54 }
  0x6e   :  { %2377 = vmatprep.subr.bf16.mxu1 %v2568_v6  ;;  %1857 = vmatprep.mubr.bf16.mxu0 %v493_v56  ;;  %v2613_v6 = vld [vmem:[#allocation5 + $0x388] sm:$0xff]  }
  0x6f   :  { %2356 = vmatpush3.bf16.msra.mxu0 %v2567_v5  ;;  %1898 = vmatprep.mubr.bf16.mxu1 %v495_v1  ;;  %v2614_v5 = vld [vmem:[#allocation5 + $0x350] sm:$0xff]  }
  0x70   :  { %2357 = vmatprep.subr.bf16.mxu0 %v2570_v7  ;;  %v2615_v7 = vld [vmem:[#allocation5 + $0x310] sm:$0xff]  }
  0x71   :  { %2378 = vmatpush3.bf16.msra.mxu1 %v2569_v8  ;;  %v2616_v8 = vld [vmem:[#allocation5 + $0x3d0] sm:$0xff]  }
  0x72   :  { %2379 = vmatprep.subr.bf16.mxu1 %v2572_v10  ;;  %v2617_v10 = vld [vmem:[#allocation5 + $0x390] sm:$0xff]  }
  0x73   :  { %2358 = vmatpush3.bf16.msra.mxu0 %v2571_v9  ;;  %v2618_v9 = vld [vmem:[#allocation5 + $0x358] sm:$0xff]   ;;  %v2655_v1 = vld [vmem:[#allocation5 + $0x410] sm:$0xff]  }
  0x74   :  { %2359 = vmatprep.subr.bf16.mxu0 %v2574_v11  ;;  %v2619_v11 = vld [vmem:[#allocation5 + $0x318] sm:$0xff]  }
  0x75   :  { %2380 = vmatpush3.bf16.msra.mxu1 %v2573_v12  ;;  %v2620_v12 = vld [vmem:[#allocation5 + $0x3d8] sm:$0xff]  }
  0x76   :  { %2381 = vmatprep.subr.bf16.mxu1 %v2576_v14  ;;  %v2621_v14 = vld [vmem:[#allocation5 + $0x398] sm:$0xff]  }
  0x77   :  { %2360 = vmatpush3.bf16.msra.mxu0 %v2575_v13  ;;  %v2622_v13 = vld [vmem:[#allocation5 + $0x360] sm:$0xff]  }
  0x78   :  { %2361 = vmatprep.subr.bf16.mxu0 %v2578_v15  ;;  %v2623_v15 = vld [vmem:[#allocation5 + $0x320] sm:$0xff]  }
  0x79   :  { %2382 = vmatpush3.bf16.msra.mxu1 %v2577_v16  ;;  %v2624_v16 = vld [vmem:[#allocation5 + $0x3e0] sm:$0xff]  }
  0x7a   :  { %2383 = vmatprep.subr.bf16.mxu1 %v2580_v18  ;;  %v2625_v18 = vld [vmem:[#allocation5 + $0x3a0] sm:$0xff]  }
  0x7b   :  { %2362 = vmatpush3.bf16.msra.mxu0 %v2579_v17  ;;  %v2626_v17 = vld [vmem:[#allocation5 + $0x368] sm:$0xff]  }
  0x7c   :  { %2363 = vmatprep.subr.bf16.mxu0 %v2582_v19  ;;  %v2627_v19 = vld [vmem:[#allocation5 + $0x328] sm:$0xff]  }
  0x7d   :  { %2384 = vmatpush3.bf16.msra.mxu1 %v2581_v20  ;;  %v2628_v20 = vld [vmem:[#allocation5 + $0x3e8] sm:$0xff]  }
  0x7e   :  { %2385 = vmatprep.subr.bf16.mxu1 %v2584_v22  ;;  %v2629_v22 = vld [vmem:[#allocation5 + $0x3a8] sm:$0xff]  }
  0x7f   :  { %2364 = vmatpush3.bf16.msra.mxu0 %v2583_v21  ;;  %v2630_v21 = vld [vmem:[#allocation5 + $0x370] sm:$0xff]  }
  0x80   :  { %2365 = vmatprep.subr.bf16.mxu0 %v2586_v23  ;;  %v2631_v23 = vld [vmem:[#allocation5 + $0x330] sm:$0xff]  }
  0x81   :  { %2386 = vmatpush3.bf16.msra.mxu1 %v2585_v24  ;;  %v2632_v24 = vld [vmem:[#allocation5 + $0x3f0] sm:$0xff]  }
  0x82   :  { %2387 = vmatprep.subr.bf16.mxu1 %v2588_v26  ;;  %v2634_v26 = vld [vmem:[#allocation5 + $0x378] sm:$0xff]  }
  0x83   :  { %2366 = vmatpush3.bf16.msra.mxu0 %v2587_v25  ;;  %v2633_v25 = vld [vmem:[#allocation5 + $0x3b0] sm:$0xff]  }
  0x84   :  { %2367 = vmatprep.subr.bf16.mxu0 %v2590_v28  ;;  %v2636_v28 = vld [vmem:[#allocation5 + $0x3f8] sm:$0xff]  }
  0x85   :  { %2388 = vmatpush3.bf16.msra.mxu1 %v2589_v27  ;;  %v2635_v27 = vld [vmem:[#allocation5 + $0x338] sm:$0xff]  }
  0x86   :  { %2389 = vmatprep.subr.bf16.mxu1 %v2592_v30  ;;  %v2639_v30 = vld [vmem:[#allocation2 + $0x60] ss:$36 sps:$4 sm:$0xff]  }
  0x87   :  { %2368 = vmatpush3.bf16.msra.mxu0 %v2591_v29  ;;  %v2637_v29 = vld [vmem:[#allocation2 + $0x18] ss:$36 sps:$4 sm:$0xff]   ;;  %v256_v37 = vrot.slane %v2639_v30, %v2800_v36 }
  0x88   :  { %2397 = vmatprep.subr.bf16.mxu0 %v2602_v42  ;;  %v242_v34 = vrot.slane %v2637_v29, %v2800_v36  ;;  %v2648_v42 = vld [vmem:[#allocation2 + $0x64] ss:$36 sps:$4 sm:$0xff]  }
  0x89   :  { %2390 = vmatpush3.bf16.msra.mxu1 %v2601_v39  ;;  %v418_v39 = vrot.slane %v2643_v33, %v2800_v36  ;;  %v263_v50 = vrot.slane %v2648_v42, %v2800_v36 }
  0x8a   :  { %2419 = vmatprep.subr.bf16.mxu1 %v2608_v55  ;;  %1858 = vmatmul.mubr.bf16.vlgmr.msra.gmra.mrb[8].mxu0 %v492_v57  ;;  %v265_v44 = vcombine.high %v242_v34, %v256_v37  ;;  %v264_v46 = vcombine.low %v242_v34, %v256_v37  ;;  %v2651_v55 = vld [vmem:[#allocation5 + $0x400] sm:$0xff]  }
  0x8b   :  { %2398 = vmatpush3.bf16.msra.mxu0 %v2607_v58  ;;  %v427_v45 = vcombine.high %v404_v38, %v418_v39  ;;  %v426_v47 = vcombine.low %v404_v38, %v418_v39  ;;  %v267_v56 = vcombine.high %v249_v49, %v263_v50  ;;  %v266_v57 = vcombine.low %v249_v49, %v263_v50  ;;  %v2652_v58 = vld [vmem:[#allocation5 + $0x448] sm:$0xff]  }
  0x8c   :  { %2399 = vmatprep.subr.bf16.mxu0 %v2610_v63  ;;  %1899 = vmatmul.mubr.bf16.vlgmr.msra.gmra.mrb[8].mxu1 %v494_v2  ;;  %v2653_v63 = vld [vmem:[#allocation5 + $0x408] sm:$0xff]   ;;  %v2656_v2 = vld [vmem:[#allocation5 + $0x458] sm:$0xff]  }
  0x8d   :  { %2420 = vmatpush3.bf16.msra.mxu1 %v2609_v0  ;;  %v497_v52 = vpack.c.bf16 %v427_v45, %v265_v44  ;;  %v496_v53 = vpack.c.bf16 %v426_v47, %v264_v46  ;;  %v499_v61 = vpack.c.bf16 %v429_v59, %v267_v56  ;;  %v498_v62 = vpack.c.bf16 %v428_v60, %v266_v57  ;;  %v2654_v0 = vld [vmem:[#allocation5 + $0x450] sm:$0xff]  }
  0x8e   :  { %2421 = vmatprep.subr.bf16.mxu1 %v2612_v4  ;;  %v2658_v4 = vld [vmem:[#allocation5 + $0x460] sm:$0xff]  }
  0x8f   :  { %2400 = vmatpush3.bf16.msra.mxu0 %v2611_v3  ;;  %1939 = vmatprep.mubr.bf16.mxu0 %v497_v52  ;;  %v2657_v3 = vld [vmem:[#allocation5 + $0x418] sm:$0xff]  }
  0x90   :  { %2401 = vmatprep.subr.bf16.mxu0 %v2614_v5  ;;  %1980 = vmatprep.mubr.bf16.mxu1 %v499_v61  ;;  %v2659_v5 = vld [vmem:[#allocation5 + $0x420] sm:$0xff]  }
  0x91   :  { %2422 = vmatpush3.bf16.msra.mxu1 %v2613_v6  ;;  %v2666_v6 = vld [vmem:[#allocation2 + $0x20] ss:$36 sps:$4 sm:$0xff]  }
  0x92   :  { %2423 = vmatprep.subr.bf16.mxu1 %v2616_v8  ;;  %v2668_v8 = vld [vmem:[#allocation2 + $0xb0] ss:$36 sps:$4 sm:$0xff]  }
  0x93   :  { %2402 = vmatpush3.bf16.msra.mxu0 %v2615_v7  ;;  %v2667_v7 = vld [vmem:[#allocation2 + $0x68] ss:$36 sps:$4 sm:$0xff]  }
  0x94   :  { %2403 = vmatprep.subr.bf16.mxu0 %v2618_v9  ;;  %v2660_v9 = vld [vmem:[#allocation5 + $0x468] sm:$0xff]  }
  0x95   :  { %2424 = vmatpush3.bf16.msra.mxu1 %v2617_v10  ;;  %v2669_v10 = vld [vmem:[#allocation2 + $0xf8] ss:$36 sps:$4 sm:$0xff]  }
  0x96   :  { %2425 = vmatprep.subr.bf16.mxu1 %v2620_v12  ;;  %v283_v12 = vrot.slane %v2667_v7, %v2800_v36 }
  0x97   :  { %2404 = vmatpush3.bf16.msra.mxu0 %v2619_v11  ;;  %v276_v11 = vrot.slane %v2666_v6, %v2800_v36 }
  0x98   :  { %2405 = vmatprep.subr.bf16.mxu0 %v2622_v13  ;;  %v438_v13 = vrot.slane %v2668_v8, %v2800_v36 }
  0x99   :  { %2426 = vmatpush3.bf16.msra.mxu1 %v2621_v14  ;;  %v445_v14 = vrot.slane %v2669_v10, %v2800_v36 }
  0x9a   :  { %2427 = vmatprep.subr.bf16.mxu1 %v2624_v16  ;;  %v285_v16 = vcombine.high %v276_v11, %v283_v12 }
  0x9b   :  { %2406 = vmatpush3.bf16.msra.mxu0 %v2623_v15  ;;  %v2661_v15 = vld [vmem:[#allocation5 + $0x428] sm:$0xff]  }
  0x9c   :  { %2407 = vmatprep.subr.bf16.mxu0 %v2626_v17  ;;  %v2662_v17 = vld [vmem:[#allocation5 + $0x470] sm:$0xff]  }
  0x9d   :  { %2428 = vmatpush3.bf16.msra.mxu1 %v2625_v18  ;;  %v447_v18 = vcombine.high %v438_v13, %v445_v14 }
  0x9e   :  { %2429 = vmatprep.subr.bf16.mxu1 %v2628_v20  ;;  %v2663_v20 = vld [vmem:[#allocation5 + $0x430] sm:$0xff]  }
  0x9f   :  { %2408 = vmatpush3.bf16.msra.mxu0 %v2627_v19  ;;  %v501_v19 = vpack.c.bf16 %v447_v18, %v285_v16 }
  0xa0   :  { %2409 = vmatprep.subr.bf16.mxu0 %v2630_v21  ;;  %v2664_v21 = vld [vmem:[#allocation5 + $0x478] sm:$0xff]  }
  0xa1   :  { %2430 = vmatpush3.bf16.msra.mxu1 %v2629_v22  ;;  %v284_v22 = vcombine.low %v276_v11, %v283_v12 }
  0xa2   :  { %2431 = vmatprep.subr.bf16.mxu1 %v2632_v24  ;;  %v2665_v24 = vld [vmem:[#allocation5 + $0x438] sm:$0xff]  }
  0xa3   :  { %2410 = vmatpush3.bf16.msra.mxu0 %v2631_v23  ;;  %v446_v23 = vcombine.low %v438_v13, %v445_v14 }
  0xa4   :  { %2411 = vmatprep.subr.bf16.mxu0 %v2634_v26  ;;  %v2115_v26 = vld [vmem:[%s2856_s2] ss:$0 sm:$0xff] }
  0xa5   :  { %2432 = vmatpush3.bf16.msra.mxu1 %v2633_v25  ;;  %v500_v25 = vpack.c.bf16 %v446_v23, %v284_v22 }
  0xa6   :  { %2433 = vmatprep.subr.bf16.mxu1 %v2636_v28 }
  0xa7   :  { %2412 = vmatpush3.bf16.msra.mxu0 %v2635_v27 }
  0xa8   :  { %2441 = vmatprep.subr.bf16.mxu0 %v2646_v40 }
  0xa9   :  { %2434 = vmatpush3.bf16.msra.mxu1 %v2645_v35 }
  0xaa   :  { %1940 = vmatmul.mubr.bf16.vlgmr.msra.gmra.mrb[12].mxu0 %v496_v53 }
  0xab   :  { %2442 = vmatpush3.bf16.msra.mxu0 %v2651_v55  ;;  %2021 = vmatprep.mubr.bf16.mxu0 %v501_v19 }
  0xac   :  { %2443 = vmatprep.subr.bf16.mxu0 %v2652_v58  ;;  %1981 = vmatmul.mubr.bf16.vlgmr.msra.gmra.mrb[12].mxu1 %v498_v62 }
  0xaf   :  { %2444 = vmatpush3.bf16.msra.mxu0 %v2653_v63 }
  0xb0   :  { %2445 = vmatprep.subr.bf16.mxu0 %v2654_v0 }
  0xb3   :  { %2446 = vmatpush3.bf16.msra.mxu0 %v2655_v1 }
  0xb4   :  { %2447 = vmatprep.subr.bf16.mxu0 %v2656_v2 }
  0xb7   :  { %2448 = vmatpush3.bf16.msra.mxu0 %v2657_v3 }
  0xb8   :  { %2449 = vmatprep.subr.bf16.mxu0 %v2658_v4 }
  0xbb   :  { %2450 = vmatpush3.bf16.msra.mxu0 %v2659_v5 }
  0xbc   :  { %2451 = vmatprep.subr.bf16.mxu0 %v2660_v9 }
  0xbf   :  { %2452 = vmatpush3.bf16.msra.mxu0 %v2661_v15 }
  0xc0   :  { %2453 = vmatprep.subr.bf16.mxu0 %v2662_v17 }
  0xc3   :  { %2454 = vmatpush3.bf16.msra.mxu0 %v2663_v20 }
  0xc4   :  { %2455 = vmatprep.subr.bf16.mxu0 %v2664_v21 }
  0xc7   :  { %2456 = vmatpush3.bf16.msra.mxu0 %v2665_v24 }
  0xca   :  { %2022 = vmatmul.mubr.bf16.vlgmr.msra.gmra.mrb[16].mxu0 %v500_v25 }
 0x11d   :  { %v2281_v36 = vpop.f32.mrb[0].mxu0 }
 0x11e   :  { %v2282_v27 = vpop.f32.mrb[1].mxu0 }
 0x11f   :  { %v2283_v28 = vadd.f32 %v2282_v27, %v2281_v36  ;;  %v2284_v29 = vpop.f32.mrb[2].mxu0  ;;  %v2303_v33 = vpop.f32.mrb[0].mxu1  ;;  %v2749_v27 = vmov 1966171168  }
 0x120   :  { %v2285_v30 = vpop.f32.mrb[3].mxu0  ;;  %v2304_v35 = vpop.f32.mrb[1].mxu1 }
 0x121   :  { %v1696_v31 = vadd.f32 %v2283_v28, %v2115_v26  ;;  %v2286_v34 = vadd.f32 %v2285_v30, %v2284_v29  ;;  %v2305_v38 = vadd.f32 %v2304_v35, %v2303_v33  ;;  %v2306_v39 = vpop.f32.mrb[2].mxu1  ;;  %v2034_v28 = vunpack.c.l.s4 %v2749_v27 }
 0x122   :  { %v2307_v40 = vpop.f32.mrb[3].mxu1 }
 0x123   :  { %v1699_v37 = vadd.f32 %v2286_v34, %v2115_v26  ;;  %v1737_v41 = vadd.f32 %v2305_v38, %v1696_v31  ;;  %v2308_v42 = vadd.f32 %v2307_v40, %v2306_v39  ;;  %v2035_v34 = vunpack.c.0.s8 %v2034_v28 }
 0x125   :  { %v1740_v43 = vadd.f32 %v2308_v42, %v1699_v37  ;;  %v2038_v40 = vsub.s32 %v2035_v34, %v2797_v32 }
 0x13d   :  { %v2325_v44 = vpop.f32.mrb[4].mxu0 }
 0x13e   :  { %v2326_v45 = vpop.f32.mrb[5].mxu0 }
 0x13f   :  { %v2327_v46 = vadd.f32 %v2326_v45, %v2325_v44  ;;  %v2328_v47 = vpop.f32.mrb[6].mxu0  ;;  %v2347_v48 = vpop.f32.mrb[4].mxu1 }
 0x140   :  { %v2329_v49 = vpop.f32.mrb[7].mxu0  ;;  %v2348_v52 = vpop.f32.mrb[5].mxu1 }
 0x141   :  { %v1778_v50 = vadd.f32 %v2327_v46, %v1737_v41  ;;  %v2330_v51 = vadd.f32 %v2329_v49, %v2328_v47  ;;  %v2349_v53 = vadd.f32 %v2348_v52, %v2347_v48  ;;  %v2350_v54 = vpop.f32.mrb[6].mxu1 }
 0x142   :  { %v2351_v56 = vpop.f32.mrb[7].mxu1 }
 0x143   :  { %v1781_v55 = vadd.f32 %v2330_v51, %v1740_v43  ;;  %v1819_v57 = vadd.f32 %v2349_v53, %v1778_v50  ;;  %v2352_v58 = vadd.f32 %v2351_v56, %v2350_v54 }
 0x145   :  { %v1822_v59 = vadd.f32 %v2352_v58, %v1781_v55 }
 0x15d   :  { %v2369_v60 = vpop.f32.mrb[8].mxu0 }
 0x15e   :  { %v2370_v61 = vpop.f32.mrb[9].mxu0 }
 0x15f   :  { %v2371_v62 = vadd.f32 %v2370_v61, %v2369_v60  ;;  %v2372_v63 = vpop.f32.mrb[10].mxu0  ;;  %v2391_v0 = vpop.f32.mrb[8].mxu1 }
 0x160   :  { %v2373_v1 = vpop.f32.mrb[11].mxu0  ;;  %v2392_v4 = vpop.f32.mrb[9].mxu1 }
 0x161   :  { %v1860_v2 = vadd.f32 %v2371_v62, %v1819_v57  ;;  %v2374_v3 = vadd.f32 %v2373_v1, %v2372_v63  ;;  %v2393_v5 = vadd.f32 %v2392_v4, %v2391_v0  ;;  %v2394_v6 = vpop.f32.mrb[10].mxu1 }
 0x162   :  { %v2395_v8 = vpop.f32.mrb[11].mxu1 }
 0x163   :  { %v1863_v7 = vadd.f32 %v2374_v3, %v1822_v59  ;;  %v1901_v9 = vadd.f32 %v2393_v5, %v1860_v2  ;;  %v2396_v10 = vadd.f32 %v2395_v8, %v2394_v6 }
 0x165   :  { %v1904_v11 = vadd.f32 %v2396_v10, %v1863_v7 }
 0x17d   :  { %v2413_v12 = vpop.f32.mrb[12].mxu0 }
 0x17e   :  { %v2414_v13 = vpop.f32.mrb[13].mxu0 }
 0x17f   :  { %v2415_v14 = vadd.f32 %v2414_v13, %v2413_v12  ;;  %v2416_v15 = vpop.f32.mrb[14].mxu0  ;;  %v2435_v18 = vpop.f32.mrb[12].mxu1 }
 0x180   :  { %v2417_v16 = vpop.f32.mrb[15].mxu0  ;;  %v2436_v20 = vpop.f32.mrb[13].mxu1 }
 0x181   :  { %v1942_v17 = vadd.f32 %v2415_v14, %v1901_v9  ;;  %v2418_v19 = vadd.f32 %v2417_v16, %v2416_v15  ;;  %v2437_v22 = vadd.f32 %v2436_v20, %v2435_v18  ;;  %v2438_v23 = vpop.f32.mrb[14].mxu1 }
 0x182   :  { %v2439_v24 = vpop.f32.mrb[15].mxu1 }
 0x183   :  { %v1945_v21 = vadd.f32 %v2418_v19, %v1904_v11  ;;  %v1983_v25 = vadd.f32 %v2437_v22, %v1942_v17  ;;  %v2440_v36 = vadd.f32 %v2439_v24, %v2438_v23 }
 0x185   :  { %v1986_v26 = vadd.f32 %v2440_v36, %v1945_v21 }
 0x19d   :  { %v2457_v29 = vpop.f32.mrb[16].mxu0 }
 0x19e   :  { %v2458_v30 = vpop.f32.mrb[17].mxu0 }
 0x19f   :  { %v2459_v31 = vadd.f32 %v2458_v30, %v2457_v29  ;;  %v2460_v33 = vpop.f32.mrb[18].mxu0 }
 0x1a0   :  { %v2461_v35 = vpop.f32.mrb[19].mxu0 }
 0x1a1   :  { %v2024_v37 = vadd.f32 %v2459_v31, %v1983_v25  ;;  %v2462_v38 = vadd.f32 %v2461_v35, %v2460_v33 }
 0x1a3   :  { %v2027_v39 = vadd.f32 %v2462_v38, %v1986_v26 }
 0x1a5   :  { %v2030_v41 = vpack.c.bf16 %v2027_v39, %v2024_v37  ;;  %v2260_v42 = vpack.c.bf16 %v2027_v39, %v2027_v39 }
 0x1a7   :  { %v2039_v43 = vrot.slane %v2030_v41, %v2038_v40  ;;  %v2046_v44 = vrot.slane %v2260_v42, %v2038_v40 }
 0x1a9   :  { %v2047_v45 = vcombine.high %v2039_v43, %v2039_v43  ;;  %v2048_v46 = vcombine.high %v2046_v44, %v2046_v44  ;;  %v2055_v47 = vrot.slane %v2039_v43, %v2038_v40  ;;  %v2062_v48 = vrot.slane %v2046_v44, %v2038_v40  ;;  %2261 = vst.sshfl [vmem:[#allocation7] sm:$0x1 pattern:$0x73625140] %v2039_v43 }
 0x1aa   :  { %2263 = vst.sshfl [vmem:[#allocation7 + $0x4] sm:$0x1 pattern:$0x73625140] %v2046_v44 }
 0x1ab   :  { %v2069_v49 = vrot.slane %v2047_v45, %v2038_v40  ;;  %v2076_v50 = vrot.slane %v2048_v46, %v2038_v40  ;;  %v2077_v51 = vcombine.high %v2055_v47, %v2055_v47  ;;  %v2078_v52 = vcombine.high %v2062_v48, %v2062_v48  ;;  %2262 = vst.sshfl [vmem:[#allocation7 + $0x1] sm:$0x1 pattern:$0x73625140] %v2047_v45 }
 0x1ac   :  { %2264 = vst.sshfl [vmem:[#allocation7 + $0x5] sm:$0x1 pattern:$0x73625140] %v2048_v46 }
 0x1ad   :  { %v2079_v53 = vcombine.high %v2069_v49, %v2069_v49  ;;  %v2080_v54 = vcombine.high %v2076_v50, %v2076_v50  ;;  %2091 = vst [vmem:[#allocation7 + $0x2] sm:$0x1] %v2077_v51  ;;  %2095 = vst [vmem:[#allocation7 + $0x6] sm:$0x1] %v2078_v52 }
 0x1af   :  { %2092 = vst [vmem:[#allocation7 + $0x3] sm:$0x1] %v2079_v53  ;;  %2096 = vst [vmem:[#allocation7 + $0x7] sm:$0x1] %v2080_v54 }
 0x1b0   :  { %2101 = vsyncadd [#allocation4], 112  ;;  %s2750_s2 = smov [#allocation7]  }
 0x1b1   :  { %s2102_s14 = sshll.u32 %s2750_s2, 4  ;;  %s2103_s14 = int_to_ptr.vmem [resolvable:$true] %s2102_s14 }
 0x1b2   :  { %s2714_s15 = scalar_lea.vmem %s2103_s14, 16  ;;  %s2718_s16 = scalar_lea.vmem %s2103_s14, 128 }
 0x1b3   :  { %p2715_p2 = scmp.ne.s32.totalorder %s2103_s14, %s2714_s15  ;;  %p2719_p3 = scmp.lt.s32.totalorder %s2103_s14, %s2103_s14 }
 0x1b4   :  { %p2720_p4 = scmp.lt.s32.totalorder %s2718_s16, %s2714_s15 }
 0x1b6   :  { %p2721_p5 = por %p2720_p4, %p2719_p3 }
 0x1b8   :  { %p2722_p6 = pnand %p2721_p5, %p2715_p2 }
 0x1ba   :  { %2725 = shalt.err (!%p2722_p6)
}
 0x1bb   :  { %s2726_s19 = scalar_lea.hbm %s2857_s3, 16 }
 0x1bc   :  { %p2727_p7 = scmp.ne.s32.totalorder %s2857_s3, %s2726_s19  ;;  %p2730_p8 = scmp.lt.u32.totalorder %s2726_s19, %s2857_s3 }
 0x1be   :  { %p2732_p9 = pnand %p2730_p8, %p2727_p7 }
 0x1c0   :  { %2735 = shalt.err (!%p2732_p9)
}
 0x1c1   :  { %s2751_s24 = smov 16   ;;  %s2752_s25 = smov 1  }
 0x1c2   :  { %2108 = dma.vmem_to_hbm [thread:$0]  %s2103_s14, 16, %s2857_s3, [#allocation4], %s2751_s24, %s2751_s24, %s2752_s25  }
 0x1c3   :  { %2740 = dma.done.wait [#allocation4], 128  }
 0x1c4   :  { %2741 = vsyncadd [#allocation4], 4294967168 }
 0x1c5   :  { %2112 = vsyncpa [#allocation3], 1 }
 0x1c6   :  { %2113 = vsyncpa [#allocation6], 1 }
 0x1c7   :  { %2114 = vsyncpa [#allocation4], 1 }

</bundles_post_ra>
